<compile_context>
chip_gen: v7x
topology: tpu7x:2x2x1
jax: 0.10.0
libtpu: 0.0.40
codegen_flags: <defaults>
</compile_context>

<pallas_src>
import functools

import jax
import jax.numpy as jnp
from jax.experimental import pallas as pl
from jax.experimental.pallas import tpu as pltpu

_LANE = 128
_SUBLANE = 8


def _round_up(n: int, m: int) -> int:
    return ((n + m - 1) // m) * m


def _pad_axis(a, axis: int, target: int):
    pad = target - a.shape[axis]
    if pad <= 0:
        return a
    cfg = [(0, 0)] * a.ndim
    cfg[axis] = (0, pad)
    return jnp.pad(a, cfg)


def _block_diag(ws):
    """ws: (E, in_p, out_p) -> block-diagonal (E*in_p, E*out_p)."""
    E, ip, op = ws.shape
    out = jnp.zeros((E * ip, E * op), ws.dtype)
    for e in range(E):
        out = out.at[e * ip:(e + 1) * ip, e * op:(e + 1) * op].set(ws[e])
    return out


def _concat_members_last(a):
    """a: (E, r, c) -> (r, E*c), member-major along the last dim."""
    E, r, c = a.shape
    return jnp.transpose(a, (1, 0, 2)).reshape(r, E * c)


def _ensemble_kernel(x_ref, w1_ref, b1_ref, w2_ref, b2_ref, w3_ref, b3_ref,
                     out_ref, *, n_models: int, ap: int, reduction: str,
                     compute_dtype):
    x = x_ref[...]                                                  # (Bt, obs_p)

    # Layer 1: one wide matmul over all members (N = E*h1p).
    h1 = jnp.dot(x, w1_ref[...], preferred_element_type=jnp.float32)
    h1 = jnp.maximum(h1 + b1_ref[...], 0.0)                         # (Bt, E*h1p) f32

    # Layer 2: block-diagonal weights keep members independent.
    h2 = jnp.dot(h1.astype(compute_dtype), w2_ref[...],
                 preferred_element_type=jnp.float32)
    h2 = jnp.maximum(h2 + b2_ref[...], 0.0)                         # (Bt, E*h2p) f32

    # Layer 3: block-diagonal weights -> fused per-member Q values.
    q = jnp.dot(h2.astype(compute_dtype), w3_ref[...],
                preferred_element_type=jnp.float32) + b3_ref[...]   # (Bt, E*ap) f32

    # Reduce over members via static, lane-aligned 128-wide slices.
    acc = q[:, :ap]
    for e in range(1, n_models):
        qe = q[:, e * ap:(e + 1) * ap]
        if reduction == 'min':
            acc = jnp.minimum(acc, qe)
        elif reduction == 'max':
            acc = jnp.maximum(acc, qe)
        else:                                                       # 'mean' -> sum
            acc = acc + qe
    if reduction == 'mean':
        acc = acc * (1.0 / n_models)                                # static constant

    out_ref[...] = acc                                              # single lane-dense store


def qnetwork_ensemble_forward(x, params, reduction: str = 'min',
                              compute_dtype=jnp.float32, block_b: int = 512):
    """x: (B, obs_dim) f32.  params: dict of stacked (unpadded) ensemble weights."""
    assert reduction in ('min', 'max', 'mean')
    w1, b1 = params['w1'], params['b1']
    w2, b2 = params['w2'], params['b2']
    w3, b3 = params['w3'], params['b3']

    E, obs_dim, h1 = w1.shape
    _, _, h2 = w2.shape
    _, _, n_act = w3.shape
    B = x.shape[0]

    # Padded sizes: contraction dim of layer 1 sublane-aligned, the rest lane-aligned.
    obs_p = _round_up(obs_dim, _SUBLANE)
    h1p = _round_up(h1, _LANE)
    h2p = _round_up(h2, _LANE)
    ap = _round_up(n_act, _LANE)

    # Batch tiling: Bt rows per grid step (multiple of 8, capped for VMEM on v7x).
    Bt = min(block_b, _round_up(B, _SUBLANE))
    Bt = _round_up(Bt, _SUBLANE)
    B_pad = _round_up(B, Bt)

    # --- Weight prep (one-time, outside the kernel) -------------------------
    # Layer 1: concat members along N.
    w1p = _pad_axis(_pad_axis(w1, 1, obs_p), 2, h1p)                # (E, obs_p, h1p)
    b1p = _pad_axis(b1, 2, h1p)                                     # (E, 1, h1p)
    w1_cat = _concat_members_last(w1p).astype(compute_dtype)        # (obs_p, E*h1p)
    b1_cat = _concat_members_last(b1p)                              # (1, E*h1p) f32

    # Layers 2/3: block-diagonal fused weights.
    w2p = _pad_axis(_pad_axis(w2, 1, h1p), 2, h2p)                  # (E, h1p, h2p)
    b2p = _pad_axis(b2, 2, h2p)                                     # (E, 1, h2p)
    w2_bd = _block_diag(w2p).astype(compute_dtype)                  # (E*h1p, E*h2p)
    b2_cat = _concat_members_last(b2p)                              # (1, E*h2p) f32

    w3p = _pad_axis(_pad_axis(w3, 1, h2p), 2, ap)                   # (E, h2p, ap)
    b3p = _pad_axis(b3, 2, ap)                                      # (E, 1, ap)
    w3_bd = _block_diag(w3p).astype(compute_dtype)                  # (E*h2p, E*ap)
    b3_cat = _concat_members_last(b3p)                              # (1, E*ap) f32

    # Input padding (batch rows + obs columns).
    xp = _pad_axis(_pad_axis(x, 0, B_pad), 1, obs_p).astype(compute_dtype)

    kernel = functools.partial(_ensemble_kernel, n_models=E, ap=ap,
                               reduction=reduction, compute_dtype=compute_dtype)

    itemsize = jnp.dtype(compute_dtype).itemsize
    flops = 2 * B_pad * (obs_p * E * h1p + (E * h1p) * (E * h2p)
                         + (E * h2p) * (E * ap))
    bytes_accessed = (itemsize * (xp.size + w1_cat.size + w2_bd.size + w3_bd.size)
                      + 4 * (b1_cat.size + b2_cat.size + b3_cat.size + B_pad * ap))
    cost = pl.CostEstimate(flops=flops, transcendentals=0,
                           bytes_accessed=bytes_accessed)

    out_padded = pl.pallas_call(
        kernel,
        out_shape=jax.ShapeDtypeStruct((B_pad, ap), jnp.float32),
        grid_spec=pltpu.PrefetchScalarGridSpec(
            num_scalar_prefetch=0,
            grid=(B_pad // Bt,),
            in_specs=[
                pl.BlockSpec((Bt, obs_p), lambda i: (i, 0)),
                # Constant index maps -> weights/biases stay VMEM-resident.
                pl.BlockSpec((obs_p, E * h1p), lambda i: (0, 0)),
                pl.BlockSpec((1, E * h1p), lambda i: (0, 0)),
                pl.BlockSpec((E * h1p, E * h2p), lambda i: (0, 0)),
                pl.BlockSpec((1, E * h2p), lambda i: (0, 0)),
                pl.BlockSpec((E * h2p, E * ap), lambda i: (0, 0)),
                pl.BlockSpec((1, E * ap), lambda i: (0, 0)),
            ],
            out_specs=pl.BlockSpec((Bt, ap), lambda i: (i, 0)),
        ),
        compiler_params=pltpu.CompilerParams(
            dimension_semantics=("parallel",)),
        cost_estimate=cost,
    )(xp, w1_cat, b1_cat, w2_bd, b2_cat, w3_bd, b3_cat)

    # Keep the un-pad slice adjacent to the call: padded action columns are
    # zero and must never be seen by a downstream argmax/min.
    return out_padded[:B, :n_act]


def _reference_forward(x, params, reduction):
    """Pure-JAX f32 reference mirroring the PyTorch ensemble forward."""
    def one(w1, b1, w2, b2, w3, b3):
        h1 = jnp.maximum(x @ w1 + b1[0], 0.0)
        h2 = jnp.maximum(h1 @ w2 + b2[0], 0.0)
        return h2 @ w3 + b3[0]
    qs = jax.vmap(one)(params['w1'], params['b1'], params['w2'],
                       params['b2'], params['w3'], params['b3'])    # (E, B, A)
    if reduction == 'min':
        return qs.min(axis=0)
    if reduction == 'max':
        return qs.max(axis=0)
    return qs.mean(axis=0)


def _init_params(key, n_models, obs_dim, h1, h2, n_act):
    ks = jax.random.split(key, 6)
    scale = 0.1
    return {
        'w1': scale * jax.random.normal(ks[0], (n_models, obs_dim, h1), jnp.float32),
        'b1': scale * jax.random.normal(ks[1], (n_models, 1, h1), jnp.float32),
        'w2': scale * jax.random.normal(ks[2], (n_models, h1, h2), jnp.float32),
        'b2': scale * jax.random.normal(ks[3], (n_models, 1, h2), jnp.float32),
        'w3': scale * jax.random.normal(ks[4], (n_models, h2, n_act), jnp.float32),
        'b3': scale * jax.random.normal(ks[5], (n_models, 1, n_act), jnp.float32),
    }


# TODO(synk): predict / predict_value (argmax / max over actions of the
# forward output) are trivial post-ops and are left to plain JAX outside the
# kernel; at the tiny CartPole shapes the whole call is launch-latency-bound,
# so the real-world lever is fusing this into the caller or batching states.

if __name__ == "__main__":
    key = jax.random.PRNGKey(0)
    k_x, k_p = jax.random.split(key)

    # Small, module-consistent shapes: CartPole-like obs_dim=4, n_actions=2,
    # CleanRL hidden sizes 120/84, ensemble of 3 models, batch 8.
    B, OBS, H1, H2, ACT, E = 8, 4, 120, 84, 2, 3

    x = jax.random.normal(k_x, (B, OBS), jnp.float32)
    params = _init_params(k_p, E, OBS, H1, H2, ACT)

    ok = True

    # f32 path: strict check against the pure-JAX reference.
    for reduction in ('min', 'max', 'mean'):
        out = qnetwork_ensemble_forward(x, params, reduction)
        out = jax.block_until_ready(out)
        ref = _reference_forward(x, params, reduction)
        if not jnp.allclose(out, ref, atol=1e-5, rtol=1e-5):
            ok = False
            print(f"MISMATCH (f32, {reduction}): "
                  f"max abs err = {jnp.max(jnp.abs(out - ref))}")

    # bf16 compute path: loose check (bf16 inputs, f32 MXU accumulation).
    out_bf16 = qnetwork_ensemble_forward(x, params, 'min',
                                         compute_dtype=jnp.bfloat16)
    out_bf16 = jax.block_until_ready(out_bf16)
    ref = _reference_forward(x, params, 'min')
    if not jnp.allclose(out_bf16, ref, atol=5e-2, rtol=5e-2):
        ok = False
        print(f"MISMATCH (bf16, min): "
              f"max abs err = {jnp.max(jnp.abs(out_bf16 - ref))}")

    if ok:
        print("KERNEL_OK")
</pallas_src>

<mosaic_0001>
module attributes {stable_mosaic.version = 11 : i64} {
  func.func @_ensemble_kernel(%arg0: i32, %arg1: memref<8x8xf32, #tpu.memory_space<vmem>>, %arg2: memref<8x384xf32, #tpu.memory_space<vmem>>, %arg3: memref<1x384xf32, #tpu.memory_space<vmem>>, %arg4: memref<384x384xf32, #tpu.memory_space<vmem>>, %arg5: memref<1x384xf32, #tpu.memory_space<vmem>>, %arg6: memref<384x384xf32, #tpu.memory_space<vmem>>, %arg7: memref<1x384xf32, #tpu.memory_space<vmem>>, %arg8: memref<8x128xf32, #tpu.memory_space<vmem>>) attributes {dimension_semantics = [#tpu.dimension_semantics<parallel>], iteration_bounds = array<i64: 1>, scalar_prefetch = 0 : i64, scratch_operands = 0 : i64, tpu.core_type = #tpu.core_type<tc>, window_params = [{transform_indices = @transform_0, window_bounds = array<i64: 8, 8>}, {pipeline_mode = #tpu.pipeline_mode<synchronous>, transform_indices = @transform_1, window_bounds = array<i64: 8, 384>}, {pipeline_mode = #tpu.pipeline_mode<synchronous>, transform_indices = @transform_2, window_bounds = array<i64: 1, 384>}, {pipeline_mode = #tpu.pipeline_mode<synchronous>, transform_indices = @transform_3, window_bounds = array<i64: 384, 384>}, {pipeline_mode = #tpu.pipeline_mode<synchronous>, transform_indices = @transform_4, window_bounds = array<i64: 1, 384>}, {pipeline_mode = #tpu.pipeline_mode<synchronous>, transform_indices = @transform_5, window_bounds = array<i64: 384, 384>}, {pipeline_mode = #tpu.pipeline_mode<synchronous>, transform_indices = @transform_6, window_bounds = array<i64: 1, 384>}, {transform_indices = @transform_7, window_bounds = array<i64: 8, 128>}]} {
    %c0 = arith.constant 0 : index
    %c0_0 = arith.constant 0 : index
    %0 = vector.load %arg1[%c0, %c0_0] : memref<8x8xf32, #tpu.memory_space<vmem>>, vector<8x8xf32>
    %c0_1 = arith.constant 0 : index
    %c0_2 = arith.constant 0 : index
    %1 = vector.load %arg2[%c0_1, %c0_2] : memref<8x384xf32, #tpu.memory_space<vmem>>, vector<8x384xf32>
    %cst = arith.constant dense<0.000000e+00> : vector<8x384xf32>
    %2 = tpu.matmul %0, %1, %cst {dimension_numbers = #tpu.dot_dimension_numbers<[1], [0], [0], [1], [0, 0, 1, 1], [], []>} : vector<8x8xf32>, vector<8x384xf32>, vector<8x384xf32> -> vector<8x384xf32>
    %c0_3 = arith.constant 0 : index
    %c0_4 = arith.constant 0 : index
    %3 = vector.load %arg3[%c0_3, %c0_4] : memref<1x384xf32, #tpu.memory_space<vmem>>, vector<1x384xf32>
    %4 = vector.broadcast %3 : vector<1x384xf32> to vector<8x384xf32>
    %5 = arith.addf %2, %4 : vector<8x384xf32>
    %cst_5 = arith.constant 0.000000e+00 : f32
    %6 = vector.broadcast %cst_5 : f32 to vector<8x384xf32>
    %7 = arith.maximumf %5, %6 : vector<8x384xf32>
    %c0_6 = arith.constant 0 : index
    %c0_7 = arith.constant 0 : index
    %8 = vector.load %arg4[%c0_6, %c0_7] : memref<384x384xf32, #tpu.memory_space<vmem>>, vector<384x384xf32>
    %cst_8 = arith.constant dense<0.000000e+00> : vector<8x384xf32>
    %9 = tpu.matmul %7, %8, %cst_8 {dimension_numbers = #tpu.dot_dimension_numbers<[1], [0], [0], [1], [0, 0, 1, 1], [], []>} : vector<8x384xf32>, vector<384x384xf32>, vector<8x384xf32> -> vector<8x384xf32>
    %c0_9 = arith.constant 0 : index
    %c0_10 = arith.constant 0 : index
    %10 = vector.load %arg5[%c0_9, %c0_10] : memref<1x384xf32, #tpu.memory_space<vmem>>, vector<1x384xf32>
    %11 = vector.broadcast %10 : vector<1x384xf32> to vector<8x384xf32>
    %12 = arith.addf %9, %11 : vector<8x384xf32>
    %cst_11 = arith.constant 0.000000e+00 : f32
    %13 = vector.broadcast %cst_11 : f32 to vector<8x384xf32>
    %14 = arith.maximumf %12, %13 : vector<8x384xf32>
    %c0_12 = arith.constant 0 : index
    %c0_13 = arith.constant 0 : index
    %15 = vector.load %arg6[%c0_12, %c0_13] : memref<384x384xf32, #tpu.memory_space<vmem>>, vector<384x384xf32>
    %cst_14 = arith.constant dense<0.000000e+00> : vector<8x384xf32>
    %16 = tpu.matmul %14, %15, %cst_14 {dimension_numbers = #tpu.dot_dimension_numbers<[1], [0], [0], [1], [0, 0, 1, 1], [], []>} : vector<8x384xf32>, vector<384x384xf32>, vector<8x384xf32> -> vector<8x384xf32>
    %c0_15 = arith.constant 0 : index
    %c0_16 = arith.constant 0 : index
    %17 = vector.load %arg7[%c0_15, %c0_16] : memref<1x384xf32, #tpu.memory_space<vmem>>, vector<1x384xf32>
    %18 = vector.broadcast %17 : vector<1x384xf32> to vector<8x384xf32>
    %19 = arith.addf %16, %18 : vector<8x384xf32>
    %20 = vector.extract_strided_slice %19 {offsets = [0, 0], sizes = [8, 128], strides = [1, 1]} : vector<8x384xf32> to vector<8x128xf32>
    %21 = vector.extract_strided_slice %19 {offsets = [0, 128], sizes = [8, 128], strides = [1, 1]} : vector<8x384xf32> to vector<8x128xf32>
    %22 = arith.minimumf %20, %21 : vector<8x128xf32>
    %23 = vector.extract_strided_slice %19 {offsets = [0, 256], sizes = [8, 128], strides = [1, 1]} : vector<8x384xf32> to vector<8x128xf32>
    %24 = arith.minimumf %22, %23 : vector<8x128xf32>
    %c0_17 = arith.constant 0 : index
    %c0_18 = arith.constant 0 : index
    %25 = vector.load %arg8[%c0_17, %c0_18] : memref<8x128xf32, #tpu.memory_space<vmem>>, vector<8x128xf32>
    tpu.vector_store %arg8[%c0_17, %c0_18], %24 {strides = array<i32>} : memref<8x128xf32, #tpu.memory_space<vmem>>, vector<8x128xf32>,
    return
  }
  func.func @transform_0(%arg0: i32) -> (i32, i32) {
    %c0_i32 = arith.constant 0 : i32
    %c0_i32_0 = arith.constant 0 : i32
    return %arg0, %c0_i32 : i32, i32
  }
  func.func @transform_1(%arg0: i32) -> (i32, i32) {
    %c0_i32 = arith.constant 0 : i32
    %c0_i32_0 = arith.constant 0 : i32
    %c0_i32_1 = arith.constant 0 : i32
    return %c0_i32, %c0_i32_0 : i32, i32
  }
  func.func @transform_2(%arg0: i32) -> (i32, i32) {
    %c0_i32 = arith.constant 0 : i32
    %c0_i32_0 = arith.constant 0 : i32
    %c0_i32_1 = arith.constant 0 : i32
    return %c0_i32, %c0_i32_0 : i32, i32
  }
  func.func @transform_3(%arg0: i32) -> (i32, i32) {
    %c0_i32 = arith.constant 0 : i32
    %c0_i32_0 = arith.constant 0 : i32
    %c0_i32_1 = arith.constant 0 : i32
    return %c0_i32, %c0_i32_0 : i32, i32
  }
  func.func @transform_4(%arg0: i32) -> (i32, i32) {
    %c0_i32 = arith.constant 0 : i32
    %c0_i32_0 = arith.constant 0 : i32
    %c0_i32_1 = arith.constant 0 : i32
    return %c0_i32, %c0_i32_0 : i32, i32
  }
  func.func @transform_5(%arg0: i32) -> (i32, i32) {
    %c0_i32 = arith.constant 0 : i32
    %c0_i32_0 = arith.constant 0 : i32
    %c0_i32_1 = arith.constant 0 : i32
    return %c0_i32, %c0_i32_0 : i32, i32
  }
  func.func @transform_6(%arg0: i32) -> (i32, i32) {
    %c0_i32 = arith.constant 0 : i32
    %c0_i32_0 = arith.constant 0 : i32
    %c0_i32_1 = arith.constant 0 : i32
    return %c0_i32, %c0_i32_0 : i32, i32
  }
  func.func @transform_7(%arg0: i32) -> (i32, i32) {
    %c0_i32 = arith.constant 0 : i32
    %c0_i32_0 = arith.constant 0 : i32
    return %arg0, %c0_i32 : i32, i32
  }
}

</mosaic_0001>

<bundles_post_ra>
// kernel: tpu_custom_call.1
= control target key start
LH: loop header
LB: loop body
LE: loop exit
PB: predicated region body
PF: predicated region fallthrough
CT: control target
= control target key end

     0   :  { %12 = vsyncpa [#allocation3], 0  ;;  %s1955_s0 = inlined_call_operand.hbm [shape: f32[8,8], index: 0, kind: input, shape index: {}]   ;;  %s1956_s1 = inlined_call_operand.hbm [shape: f32[8,384], index: 1, kind: input, shape index: {}]   ;;  %s1957_s2 = inlined_call_operand.vmem [shape: f32[1,384], index: 2, kind: input, shape index: {}]   ;;  %s1958_s3 = inlined_call_operand.hbm [shape: f32[384,384], index: 3, kind: input, shape index: {}]   ;;  %s1959_s4 = inlined_call_operand.vmem [shape: f32[1,384], index: 4, kind: input, shape index: {}]   ;;  %s1960_s5 = inlined_call_operand.hbm [shape: f32[384,384], index: 5, kind: input, shape index: {}]   ;;  %s1961_s6 = inlined_call_operand.vmem [shape: f32[1,384], index: 6, kind: input, shape index: {}]   ;;  %s1962_s7 = inlined_call_operand.hbm [shape: f32[8,128], index: 7, kind: output, shape index: {}]  }
   0x1   :  { %13 = vsyncpa [#allocation6], 0 }
   0x2   :  { %14 = vsyncpa [#allocation9], 0 }
   0x3   :  { %15 = vsyncpa [#allocation4], 0  ;;  %s1779_s24 = smov [#allocation5]   ;;  %s1780_s26 = smov [#allocation2]  }
   0x4   :  { %s32_s25 = sshll.u32 %s1779_s24, 4  ;;  %s22_s27 = sshll.u32 %s1780_s26, 4  ;;  %s33_s25 = int_to_ptr.vmem [resolvable:$true] %s32_s25  ;;  %s23_s27 = int_to_ptr.vmem [resolvable:$true] %s22_s27 }
   0x5   :  { %s1661_s30 = scalar_lea.hbm %s1956_s1, 384 }
   0x6   :  { %p1662_p0 = scmp.ne.s32.totalorder %s1956_s1, %s1661_s30  ;;  %p1665_p1 = scmp.lt.u32.totalorder %s1661_s30, %s1956_s1 }
   0x8   :  { %p1667_p2 = pnand %p1665_p1, %p1662_p0 }
   0xa   :  { %1670 = shalt.err (!%p1667_p2)
}
   0xb   :  { %s1671_s12 = scalar_lea.vmem %s33_s25, 384  ;;  %p1676_p4 = scmp.lt.s32.totalorder %s33_s25, %s33_s25 }
   0xc   :  { %p1672_p3 = scmp.ne.s32.totalorder %s33_s25, %s1671_s12  ;;  %p1677_p5 = scmp.lt.s32.totalorder %s1671_s12, %s1671_s12 }
   0xe   :  { %p1678_p6 = por %p1677_p5, %p1676_p4 }
  0x10   :  { %p1679_p7 = pnand %p1678_p6, %p1672_p3 }
  0x12   :  { %1682 = shalt.err (!%p1679_p7)
}
  0x13   :  { %35 = dma.hbm_to_vmem [thread:$0]  %s1956_s1, 384, %s33_s25, [#allocation6]  }
  0x14   :  { %s1683_s17 = scalar_lea.hbm %s1955_s0, 128 }
  0x15   :  { %p1684_p8 = scmp.ne.s32.totalorder %s1955_s0, %s1683_s17  ;;  %p1687_p9 = scmp.lt.u32.totalorder %s1683_s17, %s1955_s0 }
  0x17   :  { %p1689_p10 = pnand %p1687_p9, %p1684_p8 }
  0x19   :  { %1692 = shalt.err (!%p1689_p10)
}
  0x1a   :  { %s1693_s22 = scalar_lea.vmem %s23_s27, 128  ;;  %p1698_p12 = scmp.lt.s32.totalorder %s23_s27, %s23_s27 }
  0x1b   :  { %p1694_p11 = scmp.ne.s32.totalorder %s23_s27, %s1693_s22  ;;  %p1699_p13 = scmp.lt.s32.totalorder %s1693_s22, %s1693_s22 }
  0x1d   :  { %p1700_p0 = por %p1699_p13, %p1698_p12 }
  0x1f   :  { %p1701_p1 = pnand %p1700_p0, %p1694_p11 }
  0x21   :  { %1704 = shalt.err (!%p1701_p1)
}
  0x22   :  { %25 = dma.hbm_to_vmem [thread:$0]  %s1955_s0, 128, %s23_s27, [#allocation3]  }
  0x23   :  { %s1781_s24 = smov [#allocation7]   ;;  %s1705_s29 = scalar_lea.hbm %s1958_s3, 18432 }
  0x24   :  { %s43_s25 = sshll.u32 %s1781_s24, 4  ;;  %p1706_p2 = scmp.ne.s32.totalorder %s1958_s3, %s1705_s29  ;;  %s44_s25 = int_to_ptr.vmem [resolvable:$true] %s43_s25 }
  0x25   :  { %p1709_p3 = scmp.lt.u32.totalorder %s1705_s29, %s1958_s3 }
  0x27   :  { %p1711_p4 = pnand %p1709_p3, %p1706_p2 }
  0x29   :  { %1714 = shalt.err (!%p1711_p4)
}
  0x2a   :  { %s1715_s11 = scalar_lea.vmem %s44_s25, 18432  ;;  %p1720_p6 = scmp.lt.s32.totalorder %s44_s25, %s44_s25 }
  0x2b   :  { %p1716_p5 = scmp.ne.s32.totalorder %s44_s25, %s1715_s11  ;;  %p1721_p7 = scmp.lt.s32.totalorder %s1715_s11, %s1715_s11 }
  0x2d   :  { %p1722_p8 = por %p1721_p7, %p1720_p6 }
  0x2f   :  { %p1723_p9 = pnand %p1722_p8, %p1716_p5 }
  0x31   :  { %1726 = shalt.err (!%p1723_p9)
}
  0x32   :  { %s1782_s0 = smov 384   ;;  %s1783_s27 = smov 24  }
  0x33   :  { %49 = dma.hbm_to_vmem [thread:$0]  %s1958_s3, 18432, %s44_s25, [#allocation6], %s1782_s0, %s1782_s0, %s1783_s27  }
  0x34   :  { %s1784_s14 = smov [#allocation8]   ;;  %s1727_s18 = scalar_lea.hbm %s1960_s5, 18432 }
  0x35   :  { %s57_s15 = sshll.u32 %s1784_s14, 4  ;;  %p1728_p10 = scmp.ne.s32.totalorder %s1960_s5, %s1727_s18  ;;  %s58_s15 = int_to_ptr.vmem [resolvable:$true] %s57_s15 }
  0x36   :  { %p1731_p11 = scmp.lt.u32.totalorder %s1727_s18, %s1960_s5 }
  0x38   :  { %p1733_p12 = pnand %p1731_p11, %p1728_p10 }
  0x3a   :  { %1736 = shalt.err (!%p1733_p12)
}
  0x3b   :  { %s1737_s1 = scalar_lea.vmem %s58_s15, 18432  ;;  %p1742_p0 = scmp.lt.s32.totalorder %s58_s15, %s58_s15 }
  0x3c   :  { %p1738_p13 = scmp.ne.s32.totalorder %s58_s15, %s1737_s1  ;;  %p1743_p1 = scmp.lt.s32.totalorder %s1737_s1, %s1737_s1 }
  0x3e   :  { %p1744_p2 = por %p1743_p1, %p1742_p0 }
  0x40   :  { %p1745_p3 = pnand %p1744_p2, %p1738_p13 }
  0x42   :  { %1748 = shalt.err (!%p1745_p3)
}
  0x43   :  { %63 = dma.hbm_to_vmem [thread:$0]  %s1960_s5, 18432, %s58_s15, [#allocation9], %s1782_s0, %s1782_s0, %s1783_s27  }
  0x44   :  { %1771 = dma.done.wait [#allocation3], 128  }
  0x45   :  { %1772 = vsyncadd [#allocation3], 4294967168 }
  0x46   :  { %1773 = dma.done.wait [#allocation6], 18816  }
  0x47   :  { %1774 = vsyncadd [#allocation6], 4294948480 }
  0x48   :  { %1775 = dma.done.wait [#allocation9], 18432  }
  0x49   :  { %1776 = vsyncadd [#allocation9], 4294948864  ;;  %v1785_v0 = vmov 0.0   ;;  %vm1786_vm0 = vmmov 0   ;;  %v80_v1 = vld [vmem:[#allocation5 + $0x8] sm:$0xff]  ;;  %v79_v2 = vld [vmem:[#allocation5] sm:$0xff] }
  0x4a   :  { %167 = vmatprep.mubr.f32.mxu0 %v1785_v0  ;;  %1264 = vmatprep.subr.mxu1 %v1785_v0  ;;  %v78_v3 = vld [vmem:[#allocation2] sm:$0xff]  ;;  %vm99_vm1 = vcmask 64512   ;;  %v81_v4 = vld [vmem:[#allocation5 + $0x10] sm:$0xff]  ;;  %v248_v5 = vld [vmem:[#allocation7 + $0x8] sm:$0xff]  ;;  %s1788_s28 = smov [#allocation10]  }
  0x4b   :  { %1266 = vmatprep.mubr.msk.f32.mxu1 %vm1786_vm0, %v1785_v0  ;;  %103 = vmatprep.subr.mxu0 %v80_v1  ;;  %v251_v6 = vld [vmem:[#allocation7 + $0x20] sm:$0xff]  ;;  %v250_v9 = vld [vmem:[#allocation7 + $0x18] sm:$0xff]  ;;  %v257_v12 = vld [vmem:[#allocation7 + $0x50] sm:$0xff]  ;;  %s1145_s29 = sshll.u32 %s1788_s28, 4  ;;  %s1146_s29 = int_to_ptr.vmem [resolvable:$true] %s1145_s29 }
  0x4c   :  { %104 = vmatpush1.msra.mxu0 %v79_v2  ;;  %1265 = vmatpush3.msra.mxu1 %v81_v4  ;;  %v1339_v7 = vpack.c.bf16 %v251_v6, %v248_v5  ;;  %v247_v8 = vld [vmem:[#allocation7] sm:$0xff]  ;;  %v254_v10 = vld [vmem:[#allocation7 + $0x38] sm:$0xff]  ;;  %v253_v13 = vld [vmem:[#allocation7 + $0x30] sm:$0xff]  ;;  %p1754_p5 = scmp.lt.s32.totalorder %s1146_s29, %s1146_s29 }
  0x4d   :  { %1156 = vmatmul.mubr.msk.f32.vlgmr.msra.gmra.mrb[0].mxu0 %vm99_vm1, %v78_v3  ;;  %1267 = vmatmul.mubr.msk.f32.vlgmr.msra.gmra.mrb[0].mxu1 %vm99_vm1, %v78_v3  ;;  %v1341_v11 = vpack.c.bf16 %v250_v9, %v247_v8  ;;  %v256_v14 = vld [vmem:[#allocation7 + $0x48] sm:$0xff]  ;;  %v1343_v15 = vpack.c.bf16 %v257_v12, %v254_v10  ;;  %v263_v17 = vld [vmem:[#allocation7 + $0x80] sm:$0xff]  ;;  %v262_v21 = vld [vmem:[#allocation7 + $0x78] sm:$0xff] }
  0x4e   :  { %1340 = vmatprep.subr.bf16.mxu0 %v1339_v7  ;;  %v260_v16 = vld [vmem:[#allocation7 + $0x68] sm:$0xff]  ;;  %v1345_v18 = vpack.c.bf16 %v256_v14, %v253_v13  ;;  %v259_v20 = vld [vmem:[#allocation7 + $0x60] sm:$0xff]  ;;  %v266_v22 = vld [vmem:[#allocation7 + $0x98] sm:$0xff] }
  0x4f   :  { %1342 = vmatpush1.bf16.msra.mxu0 %v1341_v11  ;;  %v1347_v19 = vpack.c.bf16 %v263_v17, %v260_v16  ;;  %v269_v23 = vld [vmem:[#allocation7 + $0xb0] sm:$0xff]  ;;  %v1349_v24 = vpack.c.bf16 %v262_v21, %v259_v20  ;;  %v268_v27 = vld [vmem:[#allocation7 + $0xa8] sm:$0xff]  ;;  %v275_v29 = vld [vmem:[#allocation7 + $0xe0] sm:$0xff] }
  0x50   :  { %1344 = vmatprep.subr.bf16.mxu0 %v1343_v15  ;;  %v1351_v25 = vpack.c.bf16 %v269_v23, %v266_v22  ;;  %v265_v26 = vld [vmem:[#allocation7 + $0x90] sm:$0xff]  ;;  %v272_v28 = vld [vmem:[#allocation7 + $0xc8] sm:$0xff]  ;;  %v271_v32 = vld [vmem:[#allocation7 + $0xc0] sm:$0xff] }
  0x51   :  { %v297_v30 = vld [vmem:[#allocation7 + $0x190] sm:$0xff]  ;;  %v1353_v31 = vpack.c.bf16 %v268_v27, %v265_v26  ;;  %v274_v33 = vld [vmem:[#allocation7 + $0xd8] sm:$0xff]  ;;  %v300_v34 = vld [vmem:[#allocation7 + $0x1a8] sm:$0xff]  ;;  %v1355_v35 = vpack.c.bf16 %v275_v29, %v272_v28 }
  0x52   :  { %v278_v36 = vld [vmem:[#allocation7 + $0xf8] sm:$0xff]  ;;  %v1435_v37 = vpack.c.bf16 %v300_v34, %v297_v30  ;;  %v249_v38 = vld [vmem:[#allocation7 + $0x10] sm:$0xff]  ;;  %v252_v39 = vld [vmem:[#allocation7 + $0x28] sm:$0xff]  ;;  %v1357_v46 = vpack.c.bf16 %v274_v33, %v271_v32 }
  0x53   :  { %1346 = vmatpush1.bf16.msra.mxu0 %v1345_v18  ;;  %v281_v40 = vld [vmem:[#allocation7 + $0x110] sm:$0xff]  ;;  %v1437_v41 = vpack.c.bf16 %v252_v39, %v249_v38  ;;  %v303_v42 = vld [vmem:[#allocation7 + $0x1c0] sm:$0xff]  ;;  %v306_v43 = vld [vmem:[#allocation7 + $0x1d8] sm:$0xff] }
  0x54   :  { %1348 = vmatprep.subr.bf16.mxu0 %v1347_v19  ;;  %1436 = vmatprep.subr.bf16.mxu1 %v1435_v37  ;;  %v1439_v44 = vpack.c.bf16 %v306_v43, %v303_v42  ;;  %v255_v45 = vld [vmem:[#allocation7 + $0x40] sm:$0xff]  ;;  %v277_v47 = vld [vmem:[#allocation7 + $0xf0] sm:$0xff]  ;;  %v280_v48 = vld [vmem:[#allocation7 + $0x108] sm:$0xff]  ;;  %v1359_v50 = vpack.c.bf16 %v281_v40, %v278_v36 }
  0x55   :  { %1438 = vmatpush3.bf16.msra.mxu1 %v1437_v41  ;;  %v258_v49 = vld [vmem:[#allocation7 + $0x58] sm:$0xff]  ;;  %v284_v51 = vld [vmem:[#allocation7 + $0x128] sm:$0xff]  ;;  %v309_v53 = vld [vmem:[#allocation7 + $0x1f0] sm:$0xff]  ;;  %v1361_v60 = vpack.c.bf16 %v280_v48, %v277_v47 }
  0x56   :  { %1440 = vmatprep.subr.bf16.mxu1 %v1439_v44  ;;  %v1441_v52 = vpack.c.bf16 %v258_v49, %v255_v45  ;;  %v312_v54 = vld [vmem:[#allocation7 + $0x208] sm:$0xff]  ;;  %v287_v55 = vld [vmem:[#allocation7 + $0x140] sm:$0xff]  ;;  %v261_v57 = vld [vmem:[#allocation7 + $0x70] sm:$0xff] }
  0x57   :  { %1350 = vmatpush1.bf16.msra.mxu0 %v1349_v24  ;;  %v1443_v56 = vpack.c.bf16 %v312_v54, %v309_v53  ;;  %v264_v58 = vld [vmem:[#allocation7 + $0x88] sm:$0xff]  ;;  %v315_v59 = vld [vmem:[#allocation7 + $0x220] sm:$0xff]  ;;  %v286_v62 = vld [vmem:[#allocation7 + $0x138] sm:$0xff]  ;;  %v1363_v2 = vpack.c.bf16 %v287_v55, %v284_v51 }
  0x58   :  { %1352 = vmatprep.subr.bf16.mxu0 %v1351_v25  ;;  %v283_v61 = vld [vmem:[#allocation7 + $0x120] sm:$0xff]  ;;  %v1445_v63 = vpack.c.bf16 %v264_v58, %v261_v57  ;;  %v318_v1 = vld [vmem:[#allocation7 + $0x238] sm:$0xff]  ;;  %v293_v7 = vld [vmem:[#allocation7 + $0x170] sm:$0xff] }
  0x59   :  { %1442 = vmatpush3.bf16.msra.mxu1 %v1441_v52  ;;  %v290_v3 = vld [vmem:[#allocation7 + $0x158] sm:$0xff]  ;;  %v1447_v4 = vpack.c.bf16 %v318_v1, %v315_v59  ;;  %v267_v5 = vld [vmem:[#allocation7 + $0xa0] sm:$0xff]  ;;  %v321_v8 = vld [vmem:[#allocation7 + $0x250] sm:$0xff]  ;;  %v1365_v10 = vpack.c.bf16 %v286_v62, %v283_v61 }
  0x5a   :  { %1444 = vmatprep.subr.bf16.mxu1 %v1443_v56  ;;  %v270_v6 = vld [vmem:[#allocation7 + $0xb8] sm:$0xff]  ;;  %v324_v9 = vld [vmem:[#allocation7 + $0x268] sm:$0xff]  ;;  %v289_v11 = vld [vmem:[#allocation7 + $0x150] sm:$0xff]  ;;  %v1367_v14 = vpack.c.bf16 %v293_v7, %v290_v3 }
  0x5b   :  { %1354 = vmatpush1.bf16.msra.mxu0 %v1353_v31  ;;  %v292_v12 = vld [vmem:[#allocation7 + $0x168] sm:$0xff]  ;;  %v1449_v13 = vpack.c.bf16 %v270_v6, %v267_v5  ;;  %v1451_v16 = vpack.c.bf16 %v324_v9, %v321_v8  ;;  %v273_v17 = vld [vmem:[#allocation7 + $0xd0] sm:$0xff]  ;;  %v299_v19 = vld [vmem:[#allocation7 + $0x1a0] sm:$0xff] }
  0x5c   :  { %1356 = vmatprep.subr.bf16.mxu0 %v1355_v35  ;;  %v296_v15 = vld [vmem:[#allocation7 + $0x188] sm:$0xff]  ;;  %v327_v20 = vld [vmem:[#allocation7 + $0x280] sm:$0xff]  ;;  %v330_v21 = vld [vmem:[#allocation7 + $0x298] sm:$0xff]  ;;  %v1369_v22 = vpack.c.bf16 %v292_v12, %v289_v11 }
  0x5d   :  { %1446 = vmatpush3.bf16.msra.mxu1 %v1445_v63  ;;  %v276_v18 = vld [vmem:[#allocation7 + $0xe8] sm:$0xff]  ;;  %v295_v23 = vld [vmem:[#allocation7 + $0x180] sm:$0xff]  ;;  %v298_v24 = vld [vmem:[#allocation7 + $0x198] sm:$0xff]  ;;  %v1371_v26 = vpack.c.bf16 %v299_v19, %v296_v15  ;;  %v1455_v28 = vpack.c.bf16 %v330_v21, %v327_v20 }
  0x5e   :  { %1448 = vmatprep.subr.bf16.mxu1 %v1447_v4  ;;  %v1453_v25 = vpack.c.bf16 %v276_v18, %v273_v17  ;;  %v302_v27 = vld [vmem:[#allocation7 + $0x1b8] sm:$0xff]  ;;  %v279_v29 = vld [vmem:[#allocation7 + $0x100] sm:$0xff]  ;;  %v305_v31 = vld [vmem:[#allocation7 + $0x1d0] sm:$0xff]  ;;  %v1373_v34 = vpack.c.bf16 %v298_v24, %v295_v23 }
  0x5f   :  { %1358 = vmatpush1.bf16.msra.mxu0 %v1357_v46  ;;  %v282_v30 = vld [vmem:[#allocation7 + $0x118] sm:$0xff]  ;;  %v333_v32 = vld [vmem:[#allocation7 + $0x2b0] sm:$0xff]  ;;  %v336_v33 = vld [vmem:[#allocation7 + $0x2c8] sm:$0xff]  ;;  %v1375_v37 = vpack.c.bf16 %v305_v31, %v302_v27  ;;  %v84_v27 = vlaneseq }
  0x60   :  { %1360 = vmatprep.subr.bf16.mxu0 %v1359_v50  ;;  %v301_v35 = vld [vmem:[#allocation7 + $0x1b0] sm:$0xff]  ;;  %v1457_v36 = vpack.c.bf16 %v282_v30, %v279_v29  ;;  %v304_v38 = vld [vmem:[#allocation7 + $0x1c8] sm:$0xff]  ;;  %v1459_v39 = vpack.c.bf16 %v336_v33, %v333_v32  ;;  %v311_v43 = vld [vmem:[#allocation7 + $0x200] sm:$0xff] }
  0x61   :  { %1450 = vmatpush3.bf16.msra.mxu1 %v1449_v13  ;;  %v285_v40 = vld [vmem:[#allocation7 + $0x130] sm:$0xff]  ;;  %v288_v41 = vld [vmem:[#allocation7 + $0x148] sm:$0xff]  ;;  %v1377_v44 = vpack.c.bf16 %v304_v38, %v301_v35  ;;  %v307_v47 = vld [vmem:[#allocation7 + $0x1e0] sm:$0xff] }
  0x62   :  { %1452 = vmatprep.subr.bf16.mxu1 %v1451_v16  ;;  %v308_v42 = vld [vmem:[#allocation7 + $0x1e8] sm:$0xff]  ;;  %v1461_v45 = vpack.c.bf16 %v288_v41, %v285_v40  ;;  %v310_v48 = vld [vmem:[#allocation7 + $0x1f8] sm:$0xff]  ;;  %v317_v50 = vld [vmem:[#allocation7 + $0x230] sm:$0xff] }
  0x63   :  { %1362 = vmatpush1.bf16.msra.mxu0 %v1361_v60  ;;  %v1379_v46 = vpack.c.bf16 %v311_v43, %v308_v42  ;;  %v314_v49 = vld [vmem:[#allocation7 + $0x218] sm:$0xff]  ;;  %v1381_v51 = vpack.c.bf16 %v310_v48, %v307_v47  ;;  %v313_v53 = vld [vmem:[#allocation7 + $0x210] sm:$0xff]  ;;  %v316_v54 = vld [vmem:[#allocation7 + $0x228] sm:$0xff] }
  0x64   :  { %1364 = vmatprep.subr.bf16.mxu0 %v1363_v2  ;;  %v1383_v52 = vpack.c.bf16 %v317_v50, %v314_v49  ;;  %v320_v55 = vld [vmem:[#allocation7 + $0x248] sm:$0xff]  ;;  %v323_v56 = vld [vmem:[#allocation7 + $0x260] sm:$0xff]  ;;  %v1385_v57 = vpack.c.bf16 %v316_v54, %v313_v53  ;;  %v322_v60 = vld [vmem:[#allocation7 + $0x258] sm:$0xff] }
  0x65   :  { %1454 = vmatpush3.bf16.msra.mxu1 %v1453_v25  ;;  %v1387_v58 = vpack.c.bf16 %v323_v56, %v320_v55  ;;  %v319_v59 = vld [vmem:[#allocation7 + $0x240] sm:$0xff]  ;;  %v326_v61 = vld [vmem:[#allocation7 + $0x278] sm:$0xff]  ;;  %v329_v62 = vld [vmem:[#allocation7 + $0x290] sm:$0xff] }
  0x66   :  { %1456 = vmatprep.subr.bf16.mxu1 %v1455_v28  ;;  %v1389_v63 = vpack.c.bf16 %v322_v60, %v319_v59  ;;  %v1391_v1 = vpack.c.bf16 %v329_v62, %v326_v61  ;;  %v325_v2 = vld [vmem:[#allocation7 + $0x270] sm:$0xff]  ;;  %v328_v3 = vld [vmem:[#allocation7 + $0x288] sm:$0xff]  ;;  %v335_v5 = vld [vmem:[#allocation7 + $0x2c0] sm:$0xff]  ;;  %v1882_v28 = vshrl.u32 %v84_v27, 7 }
  0x67   :  { %1366 = vmatpush1.bf16.msra.mxu0 %v1365_v10  ;;  %v332_v4 = vld [vmem:[#allocation7 + $0x2a8] sm:$0xff]  ;;  %v1393_v6 = vpack.c.bf16 %v328_v3, %v325_v2  ;;  %v331_v8 = vld [vmem:[#allocation7 + $0x2a0] sm:$0xff]  ;;  %v334_v9 = vld [vmem:[#allocation7 + $0x2b8] sm:$0xff] }
  0x68   :  { %1368 = vmatprep.subr.bf16.mxu0 %v1367_v14  ;;  %v1395_v7 = vpack.c.bf16 %v335_v5, %v332_v4  ;;  %v1397_v10 = vpack.c.bf16 %v334_v9, %v331_v8  ;;  %v338_v11 = vld [vmem:[#allocation7 + $0x2d8] sm:$0xff]  ;;  %v341_v12 = vld [vmem:[#allocation7 + $0x2f0] sm:$0xff]  ;;  %v339_v13 = vld [vmem:[#allocation7 + $0x2e0] sm:$0xff]  ;;  %v1885_v29 = vsub.s32 0, %v1882_v28  ;;  %v1893_v31 = vsub.s32 1, %v1882_v28 }
  0x69   :  { %1458 = vmatpush3.bf16.msra.mxu1 %v1457_v36  ;;  %v1399_v14 = vpack.c.bf16 %v341_v12, %v338_v11  ;;  %v342_v15 = vld [vmem:[#allocation7 + $0x2f8] sm:$0xff]  ;;  %v337_v16 = vld [vmem:[#allocation7 + $0x2d0] sm:$0xff]  ;;  %v340_v17 = vld [vmem:[#allocation7 + $0x2e8] sm:$0xff] }
  0x6a   :  { %1460 = vmatprep.subr.bf16.mxu1 %v1459_v39  ;;  %v1463_v18 = vpack.c.bf16 %v342_v15, %v339_v13  ;;  %v1401_v19 = vpack.c.bf16 %v340_v17, %v337_v16  ;;  %v291_v20 = vld [vmem:[#allocation7 + $0x160] sm:$0xff]  ;;  %v294_v21 = vld [vmem:[#allocation7 + $0x178] sm:$0xff]  ;;  %v344_v23 = vld [vmem:[#allocation7 + $0x308] sm:$0xff] }
  0x6b   :  { %1370 = vmatpush1.bf16.msra.mxu0 %v1369_v22  ;;  %v1465_v22 = vpack.c.bf16 %v294_v21, %v291_v20  ;;  %v347_v24 = vld [vmem:[#allocation7 + $0x320] sm:$0xff]  ;;  %v346_v39 = vld [vmem:[#allocation7 + $0x318] sm:$0xff]  ;;  %v345_v40 = vld [vmem:[#allocation7 + $0x310] sm:$0xff] }
  0x6c   :  { %1372 = vmatprep.subr.bf16.mxu0 %v1371_v26  ;;  %v1403_v25 = vpack.c.bf16 %v347_v24, %v344_v23  ;;  %v1787_v26 = vmov 0.0|0.0   ;;  %v1890_v30 = vld [vmem:[%s1957_s2] sm:$0x7]  ;;  %v348_v41 = vld [vmem:[#allocation7 + $0x328] sm:$0xff]  ;;  %v349_v49 = vld [vmem:[#allocation7 + $0x330] sm:$0xff] }
  0x6d   :  { %1462 = vmatpush3.bf16.msra.mxu1 %v1461_v45  ;;  %v87_v32 = vrot.slane %v1890_v30, %v1885_v29  ;;  %v91_v33 = vrot.slane %v1890_v30, %v1893_v31  ;;  %v343_v35 = vld [vmem:[#allocation7 + $0x300] sm:$0xff]  ;;  %v353_v45 = vld [vmem:[#allocation7 + $0x350] sm:$0xff]  ;;  %v1468_v48 = vpack.c.bf16 %v348_v41, %v345_v40  ;;  %v354_v54 = vld [vmem:[#allocation7 + $0x358] sm:$0xff] }
  0x6e   :  { %1464 = vmatprep.subr.bf16.mxu1 %v1463_v18  ;;  %v1405_v47 = vpack.c.bf16 %v346_v39, %v343_v35  ;;  %v351_v53 = vld [vmem:[#allocation7 + $0x340] sm:$0xff]  ;;  %v356_v55 = vld [vmem:[#allocation7 + $0x368] sm:$0xff]  ;;  %v358_v61 = vld [vmem:[#allocation7 + $0x378] sm:$0xff]  ;;  %v1909_v35 = vsub.s32 2, %v1882_v28 }
  0x6f   :  { %1374 = vmatpush1.bf16.msra.mxu0 %v1373_v34  ;;  %v359_v56 = vld [vmem:[#allocation7 + $0x380] sm:$0xff]  ;;  %v357_v62 = vld [vmem:[#allocation7 + $0x370] sm:$0xff]  ;;  %v366_v9 = vld [vmem:[#allocation7 + $0x3b8] sm:$0xff] }
  0x70   :  { %1376 = vmatprep.subr.bf16.mxu0 %v1375_v37  ;;  %v355_v59 = vld [vmem:[#allocation7 + $0x360] sm:$0xff]  ;;  %v1411_v60 = vpack.c.bf16 %v359_v56, %v356_v55  ;;  %v365_v2 = vld [vmem:[#allocation7 + $0x3b0] sm:$0xff]  ;;  %v370_v16 = vld [vmem:[#allocation7 + $0x3d8] sm:$0xff] }
  0x71   :  { %1466 = vmatpush3.bf16.msra.mxu1 %v1465_v22  ;;  %v1413_v3 = vpack.c.bf16 %v358_v61, %v355_v59  ;;  %v361_v5 = vld [vmem:[#allocation7 + $0x390] sm:$0xff]  ;;  %v363_v8 = vld [vmem:[#allocation7 + $0x3a0] sm:$0xff]  ;;  %v372_v18 = vld [vmem:[#allocation7 + $0x3e8] sm:$0xff] }
  0x72   :  { %1467 = vmatprep.subr.bf16.mxu1 %v1787_v26  ;;  %v371_v11 = vld [vmem:[#allocation7 + $0x3e0] sm:$0xff]  ;;  %v1477_v13 = vpack.c.bf16 %v366_v9, %v363_v8  ;;  %v369_v17 = vld [vmem:[#allocation7 + $0x3d0] sm:$0xff]  ;;  %v382_v41 = vld [vmem:[#allocation7 + $0x438] sm:$0xff] }
  0x73   :  { %1378 = vmatpush1.bf16.msra.mxu0 %v1377_v44  ;;  %v350_v44 = vld [vmem:[#allocation7 + $0x338] sm:$0xff]  ;;  %v377_v20 = vld [vmem:[#allocation7 + $0x410] sm:$0xff]  ;;  %v1480_v22 = vpack.c.bf16 %v372_v18, %v369_v17  ;;  %v375_v27 = vld [vmem:[#allocation7 + $0x400] sm:$0xff] }
  0x74   :  { %1380 = vmatprep.subr.bf16.mxu0 %v1379_v46  ;;  %v373_v23 = vld [vmem:[#allocation7 + $0x3f0] sm:$0xff]  ;;  %v379_v39 = vld [vmem:[#allocation7 + $0x420] sm:$0xff]  ;;  %v696_v59 = vld [vmem:[#allocation8 + $0x18] sm:$0xff] }
  0x75   :  { %v1429_v28 = vpack.c.bf16 %v382_v41, %v379_v39  ;;  %v703_v61 = vld [vmem:[#allocation8 + $0x50] sm:$0xff]  ;;  %v708_v8 = vld [vmem:[#allocation8 + $0x78] sm:$0xff] }
  0x76   :  { %v712_v9 = vld [vmem:[#allocation8 + $0x98] sm:$0xff] }
  0x77   :  { %1382 = vmatpush1.bf16.msra.mxu0 %v1381_v51  ;;  %v1407_v51 = vpack.c.bf16 %v353_v45, %v350_v44  ;;  %v386_v44 = vld [vmem:[#allocation7 + $0x458] sm:$0xff]  ;;  %v389_v45 = vld [vmem:[#allocation7 + $0x470] sm:$0xff] }
  0x78   :  { %1384 = vmatprep.subr.bf16.mxu0 %v1383_v52  ;;  %v352_v52 = vld [vmem:[#allocation7 + $0x348] sm:$0xff]  ;;  %v732_v39 = vld [vmem:[#allocation8 + $0x138] sm:$0xff] }
  0x79   :  { %v736_v41 = vld [vmem:[#allocation8 + $0x158] sm:$0xff] }
  0x7b   :  { %1386 = vmatpush1.bf16.msra.mxu0 %v1385_v57  ;;  %v1409_v57 = vpack.c.bf16 %v352_v52, %v349_v49  ;;  %v1431_v49 = vpack.c.bf16 %v389_v45, %v386_v44  ;;  %v390_v52 = vld [vmem:[#allocation7 + $0x478] sm:$0xff]  ;;  %v735_v44 = vld [vmem:[#allocation8 + $0x150] sm:$0xff]  ;;  %v738_v45 = vld [vmem:[#allocation8 + $0x168] sm:$0xff] }
  0x7c   :  { %1388 = vmatprep.subr.bf16.mxu0 %v1387_v58  ;;  %v1471_v58 = vpack.c.bf16 %v354_v54, %v351_v53  ;;  %v694_v53 = vld [vmem:[#allocation8 + $0x8] sm:$0xff]  ;;  %v697_v54 = vld [vmem:[#allocation8 + $0x20] sm:$0xff] }
  0x7f   :  { %1390 = vmatpush1.bf16.msra.mxu0 %v1389_v63  ;;  %v360_v63 = vld [vmem:[#allocation7 + $0x388] sm:$0xff] }
  0x80   :  { %1392 = vmatprep.subr.bf16.mxu0 %v1391_v1  ;;  %v362_v1 = vld [vmem:[#allocation7 + $0x398] sm:$0xff]  ;;  %v1474_v4 = vpack.c.bf16 %v360_v63, %v357_v62 }
  0x83   :  { %1394 = vmatpush1.bf16.msra.mxu0 %v1393_v6  ;;  %v1415_v6 = vpack.c.bf16 %v365_v2, %v362_v1  ;;  %v699_v2 = vld [vmem:[#allocation8 + $0x30] sm:$0xff] }
  0x84   :  { %1396 = vmatprep.subr.bf16.mxu0 %v1395_v7  ;;  %v364_v7 = vld [vmem:[#allocation7 + $0x3a8] sm:$0xff] }
  0x85   :  { %v1417_v12 = vpack.c.bf16 %v364_v7, %v361_v5  ;;  %v705_v7 = vld [vmem:[#allocation8 + $0x60] sm:$0xff] }
  0x87   :  { %1398 = vmatpush1.bf16.msra.mxu0 %v1397_v10  ;;  %v368_v10 = vld [vmem:[#allocation7 + $0x3c8] sm:$0xff] }
  0x88   :  { %1400 = vmatprep.subr.bf16.mxu0 %v1399_v14  ;;  %v367_v14 = vld [vmem:[#allocation7 + $0x3c0] sm:$0xff]  ;;  %v1419_v15 = vpack.c.bf16 %v371_v11, %v368_v10  ;;  %v715_v10 = vld [vmem:[#allocation8 + $0xb0] sm:$0xff]  ;;  %v1501_v11 = vpack.c.bf16 %v708_v8, %v705_v7 }
  0x89   :  { %v1421_v21 = vpack.c.bf16 %v370_v16, %v367_v14  ;;  %v714_v14 = vld [vmem:[#allocation8 + $0xa8] sm:$0xff]  ;;  %v721_v16 = vld [vmem:[#allocation8 + $0xe0] sm:$0xff]  ;;  %v755_v8 = vld [vmem:[#allocation8 + $0x1f0] sm:$0xff] }
  0x8b   :  { %1402 = vmatpush1.bf16.msra.mxu0 %v1401_v19  ;;  %v374_v19 = vld [vmem:[#allocation7 + $0x3f8] sm:$0xff] }
  0x8c   :  { %1404 = vmatprep.subr.bf16.mxu0 %v1403_v25  ;;  %v1423_v24 = vpack.c.bf16 %v377_v20, %v374_v19  ;;  %v376_v25 = vld [vmem:[#allocation7 + $0x408] sm:$0xff]  ;;  %v717_v19 = vld [vmem:[#allocation8 + $0xc0] sm:$0xff]  ;;  %v720_v20 = vld [vmem:[#allocation8 + $0xd8] sm:$0xff] }
 0x120   :  { %v169_v34 = vpop.f32.mrb[0].mxu0  ;;  %v1899_v36 = vpop.f32.mrb[0].mxu1 }
 0x121   :  { %v170_v37 = vadd.f32 %v169_v34, %v87_v32  ;;  %v171_v38 = vpop.f32.mrb[1].mxu0  ;;  %v1268_v42 = vpop.f32.mrb[1].mxu1  ;;  %v378_v32 = vld [vmem:[#allocation7 + $0x418] sm:$0xff]  ;;  %v383_v34 = vld [vmem:[#allocation7 + $0x440] sm:$0xff] }
 0x122   :  { %v172_v43 = vadd.f32 %v171_v38, %v91_v33  ;;  %v380_v33 = vld [vmem:[#allocation7 + $0x428] sm:$0xff]  ;;  %v1483_v38 = vpack.c.bf16 %v378_v32, %v375_v27  ;;  %v381_v42 = vld [vmem:[#allocation7 + $0x430] sm:$0xff] }
 0x123   :  { %v244_v50 = vmax.f32 %v170_v37, 0.0  ;;  %v1425_v37 = vpack.c.bf16 %v376_v25, %v373_v23  ;;  %v1427_v40 = vpack.c.bf16 %v383_v34, %v380_v33  ;;  %v1509_v23 = vpack.c.bf16 %v720_v20, %v717_v19  ;;  %v723_v25 = vld [vmem:[#allocation8 + $0xf0] sm:$0xff]  ;;  %v726_v27 = vld [vmem:[#allocation8 + $0x108] sm:$0xff]  ;;  %v733_v33 = vld [vmem:[#allocation8 + $0x140] sm:$0xff] }
 0x124   :  { %v245_v46 = vmax.f32 %v172_v43, 0.0  ;;  %v384_v43 = vld [vmem:[#allocation7 + $0x448] sm:$0xff]  ;;  %v1513_v34 = vpack.c.bf16 %v726_v27, %v723_v25  ;;  %v764_v20 = vld [vmem:[#allocation8 + $0x238] sm:$0xff]  ;;  %v713_v25 = vld [vmem:[#allocation8 + $0xa0] sm:$0xff] }
 0x125   :  { %v730_v32 = vld [vmem:[#allocation8 + $0x128] sm:$0xff]  ;;  %v716_v27 = vld [vmem:[#allocation8 + $0xb8] sm:$0xff] }
 0x126   :  { %472 = vmatprep.mubr.f32.mxu0 %v245_v46  ;;  %614 = vmatprep.mubr.f32.mxu1 %v245_v46  ;;  %v95_v46 = vrot.slane %v1890_v30, %v1909_v35 }
 0x127   :  { %473 = vmatmul.mubr.f32.vlgmr.msra.gmra.mrb[2].mxu0 %v244_v50  ;;  %615 = vmatmul.mubr.f32.vlgmr.msra.gmra.mrb[2].mxu1 %v244_v50  ;;  %v388_v50 = vld [vmem:[#allocation7 + $0x468] sm:$0xff] }
 0x128   :  { %1406 = vmatpush1.bf16.msra.mxu0 %v1405_v47  ;;  %1469 = vmatpush3.bf16.msra.mxu1 %v1468_v48  ;;  %v1486_v47 = vpack.c.bf16 %v384_v43, %v381_v42  ;;  %v385_v48 = vld [vmem:[#allocation7 + $0x450] sm:$0xff]  ;;  %v241_v55 = vadd.f32 %v1899_v36, %v95_v46  ;;  %v702_v36 = vld [vmem:[#allocation8 + $0x48] sm:$0xff]  ;;  %v1521_v46 = vpack.c.bf16 %v738_v45, %v735_v44 }
 0x129   :  { %1408 = vmatprep.subr.bf16.mxu0 %v1407_v51  ;;  %1470 = vmatprep.subr.bf16.mxu1 %v1787_v26  ;;  %v387_v51 = vld [vmem:[#allocation7 + $0x460] sm:$0xff]  ;;  %v1433_v56 = vpack.c.bf16 %v388_v50, %v385_v48  ;;  %v1497_v5 = vpack.c.bf16 %v702_v36, %v699_v2  ;;  %v739_v42 = vld [vmem:[#allocation8 + $0x170] sm:$0xff]  ;;  %v746_v50 = vld [vmem:[#allocation8 + $0x1a8] sm:$0xff] }
 0x12a   :  { %543 = vmatprep.mubr.f32.mxu0 %v1785_v0  ;;  %1301 = vmatprep.mubr.msk.f32.mxu1 %vm1786_vm0, %v1785_v0  ;;  %v1489_v30 = vpack.c.bf16 %v390_v52, %v387_v51  ;;  %v246_v62 = vmax.f32 %v241_v55, 0.0  ;;  %v1519_v43 = vpack.c.bf16 %v739_v42, %v736_v41  ;;  %v743_v48 = vld [vmem:[#allocation8 + $0x190] sm:$0xff]  ;;  %v741_v51 = vld [vmem:[#allocation8 + $0x180] sm:$0xff]  ;;  %v744_v52 = vld [vmem:[#allocation8 + $0x198] sm:$0xff] }
 0x12b   :  { %v695_v55 = vld [vmem:[#allocation8 + $0x10] sm:$0xff]  ;;  %v701_v2 = vld [vmem:[#allocation8 + $0x40] sm:$0xff]  ;;  %v768_v41 = vld [vmem:[#allocation8 + $0x258] sm:$0xff] }
 0x12c   :  { %1410 = vmatpush1.bf16.msra.mxu0 %v1409_v57  ;;  %1472 = vmatpush3.bf16.msra.mxu1 %v1471_v58  ;;  %v1491_v57 = vpack.c.bf16 %v697_v54, %v694_v53  ;;  %v693_v58 = vld [vmem:[#allocation8] sm:$0xff]  ;;  %v1587_v53 = vpack.c.bf16 %v746_v50, %v743_v48  ;;  %v1525_v54 = vpack.c.bf16 %v744_v52, %v741_v51  ;;  %v719_v44 = vld [vmem:[#allocation8 + $0xd0] sm:$0xff]  ;;  %v722_v45 = vld [vmem:[#allocation8 + $0xe8] sm:$0xff] }
 0x12d   :  { %1412 = vmatprep.subr.bf16.mxu0 %v1411_v60  ;;  %1473 = vmatprep.subr.bf16.mxu1 %v1787_v26  ;;  %v700_v60 = vld [vmem:[#allocation8 + $0x38] sm:$0xff]  ;;  %v1493_v63 = vpack.c.bf16 %v696_v59, %v693_v58  ;;  %v751_v58 = vld [vmem:[#allocation8 + $0x1d0] sm:$0xff]  ;;  %v749_v59 = vld [vmem:[#allocation8 + $0x1c0] sm:$0xff]  ;;  %v1605_v50 = vpack.c.bf16 %v722_v45, %v719_v44 }
 0x12e   :  { %v1495_v1 = vpack.c.bf16 %v703_v61, %v700_v60  ;;  %v752_v60 = vld [vmem:[#allocation8 + $0x1d8] sm:$0xff]  ;;  %v771_v51 = vld [vmem:[#allocation8 + $0x270] sm:$0xff]  ;;  %v774_v52 = vld [vmem:[#allocation8 + $0x288] sm:$0xff] }
 0x12f   :  { %v776_v48 = vld [vmem:[#allocation8 + $0x298] sm:$0xff]  ;;  %v791_v44 = vld [vmem:[#allocation8 + $0x310] sm:$0xff]  ;;  %v794_v45 = vld [vmem:[#allocation8 + $0x328] sm:$0xff] }
 0x130   :  { %1414 = vmatpush1.bf16.msra.mxu0 %v1413_v3  ;;  %1475 = vmatpush3.bf16.msra.mxu1 %v1474_v4  ;;  %v706_v3 = vld [vmem:[#allocation8 + $0x68] sm:$0xff]  ;;  %v709_v4 = vld [vmem:[#allocation8 + $0x80] sm:$0xff] }
 0x131   :  { %1416 = vmatprep.subr.bf16.mxu0 %v1415_v6  ;;  %1476 = vmatprep.subr.bf16.mxu1 %v1787_v26  ;;  %v1499_v6 = vpack.c.bf16 %v709_v4, %v706_v3  ;;  %v704_v3 = vld [vmem:[#allocation8 + $0x58] sm:$0xff]  ;;  %v754_v4 = vld [vmem:[#allocation8 + $0x1e8] sm:$0xff] }
 0x134   :  { %1418 = vmatpush1.bf16.msra.mxu0 %v1417_v12  ;;  %1478 = vmatpush3.bf16.msra.mxu1 %v1477_v13  ;;  %v1503_v12 = vpack.c.bf16 %v715_v10, %v712_v9  ;;  %v711_v13 = vld [vmem:[#allocation8 + $0x90] sm:$0xff]  ;;  %v758_v9 = vld [vmem:[#allocation8 + $0x208] sm:$0xff]  ;;  %v753_v10 = vld [vmem:[#allocation8 + $0x1e0] sm:$0xff] }
 0x135   :  { %1420 = vmatprep.subr.bf16.mxu0 %v1419_v15  ;;  %1479 = vmatprep.subr.bf16.mxu1 %v1787_v26  ;;  %v718_v15 = vld [vmem:[#allocation8 + $0xc8] sm:$0xff]  ;;  %v1505_v17 = vpack.c.bf16 %v714_v14, %v711_v13  ;;  %v707_v13 = vld [vmem:[#allocation8 + $0x70] sm:$0xff] }
 0x136   :  { %v1507_v18 = vpack.c.bf16 %v721_v16, %v718_v15  ;;  %v710_v14 = vld [vmem:[#allocation8 + $0x88] sm:$0xff]  ;;  %v760_v15 = vld [vmem:[#allocation8 + $0x218] sm:$0xff]  ;;  %v763_v16 = vld [vmem:[#allocation8 + $0x230] sm:$0xff] }
 0x137   :  { %v1597_v19 = vpack.c.bf16 %v710_v14, %v707_v13 }
 0x138   :  { %1422 = vmatpush1.bf16.msra.mxu0 %v1421_v21  ;;  %1481 = vmatpush3.bf16.msra.mxu1 %v1480_v22  ;;  %v724_v21 = vld [vmem:[#allocation8 + $0xf8] sm:$0xff]  ;;  %v727_v22 = vld [vmem:[#allocation8 + $0x110] sm:$0xff] }
 0x139   :  { %1424 = vmatprep.subr.bf16.mxu0 %v1423_v24  ;;  %1482 = vmatprep.subr.bf16.mxu1 %v1787_v26  ;;  %v1511_v24 = vpack.c.bf16 %v727_v22, %v724_v21  ;;  %v759_v21 = vld [vmem:[#allocation8 + $0x210] sm:$0xff]  ;;  %v762_v22 = vld [vmem:[#allocation8 + $0x228] sm:$0xff] }
 0x13c   :  { %1426 = vmatpush1.bf16.msra.mxu0 %v1425_v37  ;;  %1484 = vmatpush3.bf16.msra.mxu1 %v1483_v38  ;;  %v1515_v37 = vpack.c.bf16 %v733_v33, %v730_v32  ;;  %v729_v38 = vld [vmem:[#allocation8 + $0x120] sm:$0xff]  ;;  %v766_v32 = vld [vmem:[#allocation8 + $0x248] sm:$0xff] }
 0x13d   :  { %1428 = vmatprep.subr.bf16.mxu0 %v1427_v40  ;;  %1485 = vmatprep.subr.bf16.mxu1 %v1787_v26  ;;  %v1517_v40 = vpack.c.bf16 %v732_v39, %v729_v38  ;;  %v769_v33 = vld [vmem:[#allocation8 + $0x260] sm:$0xff]  ;;  %v1537_v38 = vpack.c.bf16 %v762_v22, %v759_v21  ;;  %v1601_v39 = vpack.c.bf16 %v716_v27, %v713_v25 }
 0x13e   :  { %v1539_v42 = vpack.c.bf16 %v769_v33, %v766_v32 }
 0x140   :  { %1430 = vmatpush1.bf16.msra.mxu0 %v1429_v28  ;;  %1487 = vmatpush3.bf16.msra.mxu1 %v1486_v47  ;;  %v742_v28 = vld [vmem:[#allocation8 + $0x188] sm:$0xff]  ;;  %v745_v47 = vld [vmem:[#allocation8 + $0x1a0] sm:$0xff] }
 0x141   :  { %1432 = vmatprep.subr.bf16.mxu0 %v1431_v49  ;;  %1488 = vmatprep.subr.bf16.mxu1 %v1787_v26  ;;  %v1523_v49 = vpack.c.bf16 %v745_v47, %v742_v28  ;;  %v775_v28 = vld [vmem:[#allocation8 + $0x290] sm:$0xff]  ;;  %v773_v47 = vld [vmem:[#allocation8 + $0x280] sm:$0xff] }
 0x144   :  { %1434 = vmatpush1.bf16.msra.mxu0 %v1433_v56  ;;  %1490 = vmatpush3.bf16.msra.mxu1 %v1489_v30  ;;  %v698_v56 = vld [vmem:[#allocation8 + $0x28] sm:$0xff]  ;;  %v748_v30 = vld [vmem:[#allocation8 + $0x1b8] sm:$0xff] }
 0x145   :  { %1492 = vmatprep.subr.bf16.mxu1 %v1491_v57  ;;  %v1589_v57 = vpack.c.bf16 %v698_v56, %v695_v55  ;;  %1588 = vmatprep.subr.bf16.mxu0 %v1587_v53  ;;  %v1527_v61 = vpack.c.bf16 %v751_v58, %v748_v30  ;;  %v725_v55 = vld [vmem:[#allocation8 + $0x100] sm:$0xff]  ;;  %v728_v56 = vld [vmem:[#allocation8 + $0x118] sm:$0xff]  ;;  %v778_v30 = vld [vmem:[#allocation8 + $0x2a8] sm:$0xff] }
 0x146   :  { %v779_v58 = vld [vmem:[#allocation8 + $0x2b0] sm:$0xff] }
 0x147   :  { %544 = vmatmul.mubr.f32.vlgmr.msra.gmra.mrb[2].mxu0 %v246_v62  ;;  %1302 = vmatmul.mubr.f32.vlgmr.msra.gmra.mrb[4].mxu1 %v246_v62  ;;  %v1591_v62 = vpack.c.bf16 %v752_v60, %v749_v59  ;;  %v782_v59 = vld [vmem:[#allocation8 + $0x2c8] sm:$0xff]  ;;  %v1545_v60 = vpack.c.bf16 %v774_v52, %v771_v51  ;;  %v795_v51 = vld [vmem:[#allocation8 + $0x330] sm:$0xff] }
 0x148   :  { %1494 = vmatpush1.bf16.msra.mxu1 %v1493_v63  ;;  %v747_v63 = vld [vmem:[#allocation8 + $0x1b0] sm:$0xff]  ;;  %1590 = vmatpush3.bf16.msra.mxu0 %v1589_v57  ;;  %v781_v57 = vld [vmem:[#allocation8 + $0x2c0] sm:$0xff] }
 0x149   :  { %1496 = vmatprep.subr.bf16.mxu1 %v1495_v1  ;;  %v750_v1 = vld [vmem:[#allocation8 + $0x1c8] sm:$0xff]  ;;  %1592 = vmatprep.subr.bf16.mxu0 %v1591_v62  ;;  %v777_v62 = vld [vmem:[#allocation8 + $0x2a0] sm:$0xff] }
 0x14a   :  { %v1529_v36 = vpack.c.bf16 %v750_v1, %v747_v63  ;;  %v1547_v63 = vpack.c.bf16 %v781_v57, %v778_v30  ;;  %v1611_v1 = vpack.c.bf16 %v782_v59, %v779_v58  ;;  %v802_v30 = vld [vmem:[#allocation8 + $0x368] sm:$0xff]  ;;  %v805_v57 = vld [vmem:[#allocation8 + $0x380] sm:$0xff] }
 0x14c   :  { %1498 = vmatpush1.bf16.msra.mxu1 %v1497_v5  ;;  %v757_v5 = vld [vmem:[#allocation8 + $0x200] sm:$0xff] }
 0x14d   :  { %1500 = vmatprep.subr.bf16.mxu1 %v1499_v6  ;;  %v1593_v6 = vpack.c.bf16 %v704_v3, %v701_v2  ;;  %v1531_v7 = vpack.c.bf16 %v757_v5, %v754_v4  ;;  %v780_v2 = vld [vmem:[#allocation8 + $0x2b8] sm:$0xff]  ;;  %v734_v3 = vld [vmem:[#allocation8 + $0x148] sm:$0xff] }
 0x14e   :  { %v1549_v4 = vpack.c.bf16 %v780_v2, %v777_v62  ;;  %v804_v62 = vld [vmem:[#allocation8 + $0x378] sm:$0xff] }
 0x14f   :  { %1594 = vmatpush3.bf16.msra.mxu0 %v1593_v6  ;;  %v784_v6 = vld [vmem:[#allocation8 + $0x2d8] sm:$0xff] }
 0x150   :  { %1502 = vmatpush1.bf16.msra.mxu1 %v1501_v11  ;;  %v1595_v11 = vpack.c.bf16 %v758_v9, %v755_v8  ;;  %v785_v8 = vld [vmem:[#allocation8 + $0x2e0] sm:$0xff]  ;;  %v808_v2 = vld [vmem:[#allocation8 + $0x398] sm:$0xff] }
 0x151   :  { %1504 = vmatprep.subr.bf16.mxu1 %v1503_v12  ;;  %v756_v12 = vld [vmem:[#allocation8 + $0x1f8] sm:$0xff] }
 0x152   :  { %1596 = vmatprep.subr.bf16.mxu0 %v1595_v11  ;;  %v783_v11 = vld [vmem:[#allocation8 + $0x2d0] sm:$0xff] }
 0x153   :  { %1598 = vmatpush3.bf16.msra.mxu0 %v1597_v19  ;;  %v793_v19 = vld [vmem:[#allocation8 + $0x320] sm:$0xff] }
 0x154   :  { %1506 = vmatpush1.bf16.msra.mxu1 %v1505_v17  ;;  %v761_v17 = vld [vmem:[#allocation8 + $0x220] sm:$0xff] }
 0x155   :  { %1508 = vmatprep.subr.bf16.mxu1 %v1507_v18  ;;  %v1533_v18 = vpack.c.bf16 %v756_v12, %v753_v10  ;;  %v788_v10 = vld [vmem:[#allocation8 + $0x2f8] sm:$0xff]  ;;  %v786_v12 = vld [vmem:[#allocation8 + $0x2e8] sm:$0xff] }
 0x156   :  { %v1615_v13 = vpack.c.bf16 %v788_v10, %v785_v8  ;;  %v1553_v14 = vpack.c.bf16 %v786_v12, %v783_v11  ;;  %v809_v8 = vld [vmem:[#allocation8 + $0x3a0] sm:$0xff]  ;;  %v814_v10 = vld [vmem:[#allocation8 + $0x3c8] sm:$0xff] }
 0x157   :  { %v817_v11 = vld [vmem:[#allocation8 + $0x3e0] sm:$0xff] }
 0x158   :  { %1510 = vmatpush1.bf16.msra.mxu1 %v1509_v23  ;;  %v1535_v23 = vpack.c.bf16 %v763_v16, %v760_v15  ;;  %v737_v15 = vld [vmem:[#allocation8 + $0x160] sm:$0xff]  ;;  %v740_v16 = vld [vmem:[#allocation8 + $0x178] sm:$0xff] }
 0x159   :  { %1512 = vmatprep.subr.bf16.mxu1 %v1511_v24  ;;  %v1599_v24 = vpack.c.bf16 %v764_v20, %v761_v17  ;;  %v1617_v17 = vpack.c.bf16 %v740_v16, %v737_v15  ;;  %v816_v15 = vld [vmem:[#allocation8 + $0x3d8] sm:$0xff]  ;;  %v815_v16 = vld [vmem:[#allocation8 + $0x3d0] sm:$0xff] }
 0x15b   :  { %1600 = vmatprep.subr.bf16.mxu0 %v1599_v24  ;;  %v391_v24 = vld [vmem:[%s1959_s4] sm:$0x7] }
 0x15c   :  { %1514 = vmatpush1.bf16.msra.mxu1 %v1513_v34  ;;  %v767_v34 = vld [vmem:[#allocation8 + $0x250] sm:$0xff]  ;;  %1602 = vmatpush3.bf16.msra.mxu0 %v1601_v39  ;;  %v404_v25 = vrot.slane %v391_v24, %v1909_v35  ;;  %v396_v27 = vrot.slane %v391_v24, %v1885_v29  ;;  %v400_v32 = vrot.slane %v391_v24, %v1893_v31  ;;  %v822_v24 = vld [vmem:[#allocation8 + $0x408] sm:$0xff] }
 0x15d   :  { %1516 = vmatprep.subr.bf16.mxu1 %v1515_v37  ;;  %v770_v37 = vld [vmem:[#allocation8 + $0x268] sm:$0xff] }
 0x160   :  { %1518 = vmatpush1.bf16.msra.mxu1 %v1517_v40  ;;  %v765_v40 = vld [vmem:[#allocation8 + $0x240] sm:$0xff] }
 0x161   :  { %1520 = vmatprep.subr.bf16.mxu1 %v1519_v43  ;;  %v1603_v43 = vpack.c.bf16 %v770_v37, %v767_v34 }
 0x163   :  { %1604 = vmatprep.subr.bf16.mxu0 %v1603_v43  ;;  %v792_v43 = vld [vmem:[#allocation8 + $0x318] sm:$0xff] }
 0x164   :  { %1522 = vmatpush1.bf16.msra.mxu1 %v1521_v46  ;;  %v772_v46 = vld [vmem:[#allocation8 + $0x278] sm:$0xff]  ;;  %1606 = vmatpush3.bf16.msra.mxu0 %v1605_v50  ;;  %v1620_v50 = vpack.c.bf16 %v794_v45, %v791_v44  ;;  %v835_v45 = vld [vmem:[#allocation8 + $0x470] sm:$0xff] }
 0x165   :  { %1524 = vmatprep.subr.bf16.mxu1 %v1523_v49  ;;  %v1541_v49 = vpack.c.bf16 %v768_v41, %v765_v40  ;;  %v1543_v53 = vpack.c.bf16 %v775_v28, %v772_v46  ;;  %v796_v28 = vld [vmem:[#allocation8 + $0x338] sm:$0xff] }
 0x166   :  { %v832_v44 = vld [vmem:[#allocation8 + $0x458] sm:$0xff] }
 0x168   :  { %1526 = vmatpush1.bf16.msra.mxu1 %v1525_v54  ;;  %v1607_v54 = vpack.c.bf16 %v776_v48, %v773_v47  ;;  %v799_v47 = vld [vmem:[#allocation8 + $0x350] sm:$0xff] }
 0x169   :  { %1528 = vmatprep.subr.bf16.mxu1 %v1527_v61  ;;  %v1609_v61 = vpack.c.bf16 %v728_v56, %v725_v55  ;;  %v797_v55 = vld [vmem:[#allocation8 + $0x340] sm:$0xff]  ;;  %v800_v56 = vld [vmem:[#allocation8 + $0x358] sm:$0xff] }
 0x16a   :  { %1608 = vmatprep.subr.bf16.mxu0 %v1607_v54  ;;  %v798_v54 = vld [vmem:[#allocation8 + $0x348] sm:$0xff]  ;;  %v1623_v59 = vpack.c.bf16 %v800_v56, %v797_v55 }
 0x16b   :  { %1610 = vmatpush3.bf16.msra.mxu0 %v1609_v61  ;;  %v1561_v58 = vpack.c.bf16 %v798_v54, %v795_v51  ;;  %v1563_v61 = vpack.c.bf16 %v805_v57, %v802_v30  ;;  %v836_v51 = vld [vmem:[#allocation8 + $0x478] sm:$0xff]  ;;  %v837_v57 = vld [vmem:[%s1961_s6] sm:$0x7]  ;;  %s1749_s6 = scalar_lea.vmem %s1146_s29, 128 }
 0x16c   :  { %1530 = vmatpush1.bf16.msra.mxu1 %v1529_v36  ;;  %v731_v36 = vld [vmem:[#allocation8 + $0x130] sm:$0xff]  ;;  %1612 = vmatprep.subr.bf16.mxu0 %v1611_v1  ;;  %v806_v1 = vld [vmem:[#allocation8 + $0x388] sm:$0xff]  ;;  %p1750_p4 = scmp.ne.s32.totalorder %s1146_s29, %s1749_s6  ;;  %p1755_p6 = scmp.lt.s32.totalorder %s1749_s6, %s1749_s6 }
 0x16d   :  { %1532 = vmatprep.subr.bf16.mxu1 %v1531_v7  ;;  %v1613_v5 = vpack.c.bf16 %v734_v3, %v731_v36  ;;  %v787_v7 = vld [vmem:[#allocation8 + $0x2f0] sm:$0xff] }
 0x16e   :  { %v1551_v9 = vpack.c.bf16 %v787_v7, %v784_v6  ;;  %v811_v36 = vld [vmem:[#allocation8 + $0x3b0] sm:$0xff]  ;;  %v810_v7 = vld [vmem:[#allocation8 + $0x3a8] sm:$0xff]  ;;  %p1756_p7 = por %p1755_p6, %p1754_p5 }
 0x16f   :  { %1614 = vmatpush3.bf16.msra.mxu0 %v1613_v5  ;;  %v807_v5 = vld [vmem:[#allocation8 + $0x390] sm:$0xff]  ;;  %v1567_v6 = vpack.c.bf16 %v811_v36, %v808_v2 }
 0x170   :  { %1534 = vmatpush1.bf16.msra.mxu1 %v1533_v18  ;;  %1616 = vmatprep.subr.bf16.mxu0 %v1615_v13  ;;  %v790_v18 = vld [vmem:[#allocation8 + $0x308] sm:$0xff]  ;;  %v1569_v12 = vpack.c.bf16 %v810_v7, %v807_v5  ;;  %p1757_p8 = pnand %p1756_p7, %p1750_p4 }
 0x171   :  { %1536 = vmatprep.subr.bf16.mxu1 %v1535_v23  ;;  %v1555_v20 = vpack.c.bf16 %v793_v19, %v790_v18  ;;  %v820_v18 = vld [vmem:[#allocation8 + $0x3f8] sm:$0xff]  ;;  %v823_v19 = vld [vmem:[#allocation8 + $0x410] sm:$0xff] }
 0x173   :  { %1618 = vmatpush3.bf16.msra.mxu0 %v1617_v17  ;;  %v818_v17 = vld [vmem:[#allocation8 + $0x3e8] sm:$0xff] }
 0x174   :  { %1538 = vmatpush1.bf16.msra.mxu1 %v1537_v38  ;;  %1619 = vmatprep.subr.bf16.mxu0 %v1787_v26  ;;  %v789_v38 = vld [vmem:[#allocation8 + $0x300] sm:$0xff] }
 0x175   :  { %1540 = vmatprep.subr.bf16.mxu1 %v1539_v42 }
 0x178   :  { %1542 = vmatpush1.bf16.msra.mxu1 %v1541_v49  ;;  %v1557_v49 = vpack.c.bf16 %v792_v43, %v789_v38  ;;  %v825_v38 = vld [vmem:[#allocation8 + $0x420] sm:$0xff]  ;;  %v830_v43 = vld [vmem:[#allocation8 + $0x448] sm:$0xff] }
 0x179   :  { %1544 = vmatprep.subr.bf16.mxu1 %v1543_v53  ;;  %v1559_v53 = vpack.c.bf16 %v799_v47, %v796_v28  ;;  %v831_v47 = vld [vmem:[#allocation8 + $0x450] sm:$0xff] }
 0x17c   :  { %1546 = vmatpush1.bf16.msra.mxu1 %v1545_v60  ;;  %v801_v60 = vld [vmem:[#allocation8 + $0x360] sm:$0xff] }
 0x17d   :  { %1548 = vmatprep.subr.bf16.mxu1 %v1547_v63  ;;  %v803_v63 = vld [vmem:[#allocation8 + $0x370] sm:$0xff]  ;;  %v1565_v3 = vpack.c.bf16 %v804_v62, %v801_v60  ;;  %v846_v60 = vrot.slane %v837_v57, %v1893_v31 }
 0x180   :  { %1550 = vmatpush1.bf16.msra.mxu1 %v1549_v4  ;;  %v1626_v4 = vpack.c.bf16 %v806_v1, %v803_v63 }
 0x181   :  { %1552 = vmatprep.subr.bf16.mxu1 %v1551_v9  ;;  %v812_v9 = vld [vmem:[#allocation8 + $0x3b8] sm:$0xff] }
 0x182   :  { %v1629_v13 = vpack.c.bf16 %v812_v9, %v809_v8 }
 0x184   :  { %1554 = vmatpush1.bf16.msra.mxu1 %v1553_v14  ;;  %v813_v14 = vld [vmem:[#allocation8 + $0x3c0] sm:$0xff] }
 0x185   :  { %1556 = vmatprep.subr.bf16.mxu1 %v1555_v20  ;;  %v1573_v20 = vpack.c.bf16 %v816_v15, %v813_v14 }
 0x1fa   :  { %v1192_v21 = vpop.f32.mrb[2].mxu1 }
 0x1fb   :  { %v1193_v22 = vpop.f32.mrb[3].mxu1 }
 0x1fc   :  { %v1194_v23 = vadd.f32 %v1193_v22, %v1192_v21  ;;  %v1632_v21 = vpack.c.bf16 %v818_v17, %v815_v16  ;;  %v819_v22 = vld [vmem:[#allocation8 + $0x3f0] sm:$0xff] }
 0x1fe   :  { %v617_v33 = vadd.f32 %v1194_v23, %v404_v25  ;;  %v1575_v23 = vpack.c.bf16 %v823_v19, %v820_v18  ;;  %v821_v25 = vld [vmem:[#allocation8 + $0x400] sm:$0xff] }
 0x21a   :  { %v545_v34 = vpop.f32.mrb[2].mxu0  ;;  %v686_v37 = vpop.f32.mrb[4].mxu1 }
 0x21b   :  { %v1643_v39 = vadd.f32 %v545_v34, %v396_v27  ;;  %v1924_v40 = vadd.f32 %v686_v37, %v617_v33  ;;  %v547_v41 = vpop.f32.mrb[3].mxu0  ;;  %v1303_v42 = vpop.f32.mrb[5].mxu1  ;;  %v824_v27 = vld [vmem:[#allocation8 + $0x418] sm:$0xff]  ;;  %v829_v33 = vld [vmem:[#allocation8 + $0x440] sm:$0xff]  ;;  %v1577_v34 = vpack.c.bf16 %v822_v24, %v819_v22 }
 0x21c   :  { %v1644_v46 = vadd.f32 %v547_v41, %v400_v32  ;;  %v826_v32 = vld [vmem:[#allocation8 + $0x428] sm:$0xff]  ;;  %v1635_v37 = vpack.c.bf16 %v824_v27, %v821_v25  ;;  %v828_v41 = vld [vmem:[#allocation8 + $0x438] sm:$0xff]  ;;  %v827_v42 = vld [vmem:[#allocation8 + $0x430] sm:$0xff] }
 0x21d   :  { %v690_v52 = vmax.f32 %v1643_v39, 0.0  ;;  %v1579_v39 = vpack.c.bf16 %v829_v33, %v826_v32  ;;  %v1638_v28 = vpack.c.bf16 %v830_v43, %v827_v42  ;;  %v692_v54 = vmax.f32 %v1924_v40, 0.0 }
 0x21e   :  { %v691_v48 = vmax.f32 %v1644_v46, 0.0  ;;  %v1581_v46 = vpack.c.bf16 %v828_v41, %v825_v38 }
 0x220   :  { %918 = vmatprep.mubr.f32.mxu1 %v691_v48  ;;  %1060 = vmatprep.mubr.f32.mxu0 %v691_v48  ;;  %v1583_v48 = vpack.c.bf16 %v835_v45, %v832_v44 }
 0x221   :  { %919 = vmatmul.mubr.f32.vlgmr.msra.gmra.mrb[6].mxu1 %v690_v52  ;;  %1061 = vmatmul.mubr.f32.vlgmr.msra.gmra.mrb[4].mxu0 %v690_v52 }
 0x222   :  { %1558 = vmatpush1.bf16.msra.mxu1 %v1557_v49  ;;  %1621 = vmatpush3.bf16.msra.mxu0 %v1620_v50  ;;  %v834_v49 = vld [vmem:[#allocation8 + $0x468] sm:$0xff]  ;;  %v833_v50 = vld [vmem:[#allocation8 + $0x460] sm:$0xff] }
 0x223   :  { %1560 = vmatprep.subr.bf16.mxu1 %v1559_v53  ;;  %1622 = vmatprep.subr.bf16.mxu0 %v1787_v26  ;;  %v1585_v52 = vpack.c.bf16 %v834_v49, %v831_v47  ;;  %v1641_v53 = vpack.c.bf16 %v836_v51, %v833_v50 }
 0x224   :  { %989 = vmatprep.mubr.f32.mxu1 %v1785_v0  ;;  %1336 = vmatprep.mubr.msk.f32.mxu0 %vm1786_vm0, %v1785_v0  ;;  %v1571_v0 = vpack.c.bf16 %v817_v11, %v814_v10 }
 0x226   :  { %1562 = vmatpush1.bf16.msra.mxu1 %v1561_v58  ;;  %1624 = vmatpush3.bf16.msra.mxu0 %v1623_v59  ;;  %v850_v58 = vrot.slane %v837_v57, %v1909_v35  ;;  %v842_v59 = vrot.slane %v837_v57, %v1885_v29 }
 0x227   :  { %1564 = vmatprep.subr.bf16.mxu1 %v1563_v61  ;;  %1625 = vmatprep.subr.bf16.mxu0 %v1787_v26 }
 0x22a   :  { %1566 = vmatpush1.bf16.msra.mxu1 %v1565_v3  ;;  %1627 = vmatpush3.bf16.msra.mxu0 %v1626_v4 }
 0x22b   :  { %1568 = vmatprep.subr.bf16.mxu1 %v1567_v6  ;;  %1628 = vmatprep.subr.bf16.mxu0 %v1787_v26 }
 0x22e   :  { %1570 = vmatpush1.bf16.msra.mxu1 %v1569_v12  ;;  %1630 = vmatpush3.bf16.msra.mxu0 %v1629_v13 }
 0x22f   :  { %1572 = vmatprep.subr.bf16.mxu1 %v1571_v0  ;;  %1631 = vmatprep.subr.bf16.mxu0 %v1787_v26 }
 0x232   :  { %1574 = vmatpush1.bf16.msra.mxu1 %v1573_v20  ;;  %1633 = vmatpush3.bf16.msra.mxu0 %v1632_v21 }
 0x233   :  { %1576 = vmatprep.subr.bf16.mxu1 %v1575_v23  ;;  %1634 = vmatprep.subr.bf16.mxu0 %v1787_v26 }
 0x236   :  { %1578 = vmatpush1.bf16.msra.mxu1 %v1577_v34  ;;  %1636 = vmatpush3.bf16.msra.mxu0 %v1635_v37 }
 0x237   :  { %1580 = vmatprep.subr.bf16.mxu1 %v1579_v39  ;;  %1637 = vmatprep.subr.bf16.mxu0 %v1787_v26 }
 0x23a   :  { %1582 = vmatpush1.bf16.msra.mxu1 %v1581_v46  ;;  %1639 = vmatpush3.bf16.msra.mxu0 %v1638_v28 }
 0x23b   :  { %1584 = vmatprep.subr.bf16.mxu1 %v1583_v48  ;;  %1640 = vmatprep.subr.bf16.mxu0 %v1787_v26 }
 0x23e   :  { %1586 = vmatpush1.bf16.msra.mxu1 %v1585_v52  ;;  %1642 = vmatpush3.bf16.msra.mxu0 %v1641_v53 }
 0x241   :  { %990 = vmatmul.mubr.f32.vlgmr.msra.gmra.mrb[6].mxu1 %v692_v54  ;;  %1337 = vmatmul.mubr.f32.vlgmr.msra.gmra.mrb[6].mxu0 %v692_v54 }
 0x2f4   :  { %v1244_v55 = vpop.f32.mrb[4].mxu0 }
 0x2f5   :  { %v1245_v56 = vpop.f32.mrb[5].mxu0 }
 0x2f6   :  { %v1246_v30 = vadd.f32 %v1245_v56, %v1244_v55 }
 0x2f8   :  { %v1063_v26 = vadd.f32 %v1246_v30, %v850_v58 }
 0x314   :  { %v991_v61 = vpop.f32.mrb[6].mxu1  ;;  %v1132_v62 = vpop.f32.mrb[6].mxu0 }
 0x315   :  { %v1645_v63 = vadd.f32 %v991_v61, %v842_v59  ;;  %v1133_v40 = vadd.f32 %v1132_v62, %v1063_v26  ;;  %v993_v1 = vpop.f32.mrb[7].mxu1  ;;  %v1338_v2 = vpop.f32.mrb[7].mxu0 }
 0x316   :  { %v1646_v36 = vadd.f32 %v993_v1, %v846_v60 }
 0x318   :  { %v1136_v3 = vmin.f32 %v1645_v63, %v1646_v36 }
 0x31a   :  { %v1137_v4 = vmin.f32 %v1136_v3, %v1133_v40 }
 0x31c   :  { %1138 = vst [vmem:[#allocation10] sm:$0xff] %v1137_v4 }
 0x31d   :  { %1760 = shalt.err (!%p1757_p8)
}
 0x31e   :  { %s1761_s9 = scalar_lea.hbm %s1962_s7, 128 }
 0x31f   :  { %p1762_p9 = scmp.ne.s32.totalorder %s1962_s7, %s1761_s9  ;;  %p1765_p10 = scmp.lt.u32.totalorder %s1761_s9, %s1962_s7 }
 0x321   :  { %p1767_p11 = pnand %p1765_p10, %p1762_p9 }
 0x323   :  { %1770 = shalt.err (!%p1767_p11)
}
 0x324   :  { %1148 = dma.vmem_to_hbm [thread:$0]  %s1146_s29, 128, %s1962_s7, [#allocation4]  }
 0x325   :  { %1777 = dma.done.wait [#allocation4], 128  }
 0x326   :  { %1778 = vsyncadd [#allocation4], 4294967168 }
 0x327   :  { %1152 = vsyncpa [#allocation3], 1 }
 0x328   :  { %1153 = vsyncpa [#allocation6], 1 }
 0x329   :  { %1154 = vsyncpa [#allocation9], 1 }
 0x32a   :  { %1155 = vsyncpa [#allocation4], 1 }

</bundles_post_ra>
